<compile_context>
chip_gen: v7x
topology: tpu7x:2x2x1
jax: 0.10.0
libtpu: 0.0.40
codegen_flags: <defaults>
</compile_context>

<pallas_src>
import functools

import jax
import jax.numpy as jnp
from jax.experimental import pallas as pl
from jax.experimental.pallas import tpu as pltpu


def _posconv_kernel(x_ref, wb_ref, o_ref, *, compute_dtype, fold_residual):
    # x_ref : (BB, N, TC) full token sequences (row 0 of the N axis = cls token)
    # wb_ref: (4, TC)     rows = [w_left, w_center (+1 if fold_residual), w_right, bias]
    # o_ref : (BB, N, TC)
    x = x_ref[...]                                  # storage dtype
    bb, n, tc = x.shape
    xc = x.astype(compute_dtype)

    # Weights/bias live in f32 HBM; cast the tiny (1, TC) rows once per block.
    w0 = wb_ref[0:1, :].astype(compute_dtype).reshape(1, 1, tc)
    w1 = wb_ref[1:2, :].astype(compute_dtype).reshape(1, 1, tc)
    w2 = wb_ref[2:3, :].astype(compute_dtype).reshape(1, 1, tc)
    b_ = wb_ref[3:4, :].astype(compute_dtype).reshape(1, 1, tc)

    # Center tap + bias (+ residual, folded into w1 on the f32 path).
    y = w1 * xc + b_
    if not fold_residual:
        y = y + xc                                  # bf16 path: explicit residual add

    # Shifted token views of the full sequence.  Feature tokens are rows 1..N-1; rows
    # that would read the cls token or run off the end are zero (conv zero-padding):
    #   left[:, r]  = x[:, r-1] for r >= 2, else 0
    #   right[:, r] = x[:, r+1] for r <= N-2, else 0
    # Sequenced so only one shifted temporary needs to be live at a time.
    left = jnp.concatenate(
        [jnp.zeros((bb, 2, tc), compute_dtype), xc[:, 1:n - 1, :]], axis=1)
    y = y + w0 * left
    right = jnp.concatenate(
        [xc[:, 1:, :], jnp.zeros((bb, 1, tc), compute_dtype)], axis=1)
    y = y + w2 * right

    # Lane-dense full-block store, then overwrite row 0 with the cls token (exact
    # passthrough in storage dtype).  Replaces the old full-tile iota/where select.
    o_ref[...] = y.astype(o_ref.dtype)
    o_ref[:, 0:1, :] = x[:, 0:1, :]


def _vmem_capacity_bytes():
    try:
        return int(pltpu.get_tpu_info().vmem_capacity_bytes)
    except Exception:
        return 128 * 1024 * 1024


def _compute_dtype_for(x_dtype):
    # bf16 VPU exists on v6e/v7x; v5e and earlier must compute in f32.
    if jnp.dtype(x_dtype) == jnp.dtype(jnp.bfloat16):
        kind = jax.devices()[0].device_kind.lower()
        if not any(v in kind for v in ("v2", "v3", "v4", "v5")):
            return jnp.bfloat16
    return jnp.float32


def _choose_blocks(B, N, C, itemsize, compute_itemsize, vmem_cap):
    """Pick (batch_block, channel_block) from a VMEM-accurate working-set model."""
    # Per-element VMEM of one grid step: 2 in + 2 out pipeline buffers (storage dtype)
    # plus ~4 full-size compute-dtype temporaries (x, left, right, y).
    per_elem = 4 * itemsize + 4 * compute_itemsize
    if vmem_cap <= 64 * 1024 * 1024:                 # v7x: 64 MiB physical per TC
        ws_budget = 24 * 1024 * 1024
    else:                                            # v5e / v6e: 128 MiB
        ws_budget = 48 * 1024 * 1024
    max_block_elems = max(8 * 128, ws_budget // per_elem)
    # DMA-efficiency target: ~2 MiB of storage per block (~4 MiB in+out HBM traffic).
    target_elems = min(max_block_elems,
                       max(8 * 128, (2 * 1024 * 1024) // itemsize))

    # Channel tile: full C when a single-batch block fits the budget, otherwise a
    # multiple of 128 (prefer one dividing C so every store stays full-lane).
    if C <= 128 or N * C <= max_block_elems:
        tc = C
    else:
        cand = max(128, min(C, (max_block_elems // N) // 128 * 128))
        tc = cand
        while tc > 128 and C % tc:
            tc -= 128
        if C % tc:
            tc = cand

    # Batch tile: pack batches up to the target block size; keep it a divisor of B so
    # the leading grid axis has no partial blocks.
    bb = max(1, min(B, target_elems // max(1, N * tc)))
    while B % bb:
        bb -= 1

    # Guarantee at least 2 parallel grid blocks when possible so both v7x TensorCores
    # get work (no-op cost on single-TC v5e/v6e).
    if pl.cdiv(B, bb) * pl.cdiv(C, tc) < 2:
        if B >= 2:
            bb = max(1, bb // 2)
            while B % bb:
                bb -= 1
        elif C >= 256:
            tc = max(128, (C // 2) // 128 * 128)
    return bb, tc


@functools.partial(jax.jit, static_argnames=("stride", "batch_block", "channel_block"))
def pos_conv1d(x, weight, bias, *, stride=1, batch_block=None, channel_block=None):
    """PosConv1D.forward.

    x      : (B, N, C)  with N = 1 (cls token) + `size` feature tokens
    weight : (C, 1, 3)  PyTorch depthwise Conv1d weight layout (groups == C)
    bias   : (C,)
    """
    if stride != 1:
        # TODO(synk): stride > 1 path (strided conv output, no residual) not implemented.
        raise NotImplementedError("PosConv1D Pallas kernel only supports stride == 1")

    B, N, C = x.shape
    itemsize = jnp.dtype(x.dtype).itemsize
    compute_dtype = _compute_dtype_for(x.dtype)
    compute_itemsize = jnp.dtype(compute_dtype).itemsize
    # Fold the stride==1 residual into the center tap only on the f32 path: folding +1
    # into a small learned tap in bf16 would lose mantissa bits.
    fold_residual = compute_dtype == jnp.float32

    # (3, C) taps in f32 (+ folded residual when allowed), bias appended -> (4, C).
    w = jnp.transpose(weight[:, 0, :], (1, 0)).astype(jnp.float32)   # (3, C)
    if fold_residual:
        w = w.at[1, :].add(1.0)
    wb = jnp.concatenate([w, bias.reshape(1, C).astype(jnp.float32)], axis=0)

    vmem_cap = _vmem_capacity_bytes()
    bb, tc = _choose_blocks(B, N, C, itemsize, compute_itemsize, vmem_cap)
    if batch_block is not None:
        bb = int(batch_block)
    if channel_block is not None:
        tc = int(channel_block)

    # VMEM limit from the actual per-step working set (+ headroom), clamped below the
    # physical capacity of this TPU generation.
    blk_elems = bb * N * tc
    ws_bytes = blk_elems * (4 * itemsize + 4 * compute_itemsize) + 4 * (4 * tc * 4)
    vmem_limit = int(min(max(ws_bytes + (4 << 20), 16 << 20),
                         max(vmem_cap - (8 << 20), 16 << 20)))

    kernel = functools.partial(_posconv_kernel,
                               compute_dtype=compute_dtype,
                               fold_residual=fold_residual)

    return pl.pallas_call(
        kernel,
        out_shape=jax.ShapeDtypeStruct((B, N, C), x.dtype),
        grid_spec=pltpu.PrefetchScalarGridSpec(
            num_scalar_prefetch=0,
            grid=(pl.cdiv(B, bb), pl.cdiv(C, tc)),
            in_specs=[
                pl.BlockSpec((bb, N, tc), lambda b, c: (b, 0, c)),
                pl.BlockSpec((4, tc), lambda b, c: (0, c)),
            ],
            out_specs=pl.BlockSpec((bb, N, tc), lambda b, c: (b, 0, c)),
        ),
        compiler_params=pltpu.CompilerParams(
            dimension_semantics=("parallel", "parallel"),
            vmem_limit_bytes=vmem_limit,
        ),
        cost_estimate=pl.CostEstimate(
            flops=6 * B * N * C,
            transcendentals=0,
            bytes_accessed=2 * B * N * C * itemsize + 16 * C,
        ),
    )(x, wb)


def _reference(x, weight, bias):
    # Pure-JAX reference matching the PyTorch module (NCL depthwise conv + residual).
    B, N, C = x.shape
    cls_token = x[:, 0:1, :]
    feat = jnp.transpose(x[:, 1:, :], (0, 2, 1)).astype(jnp.float32)   # (B, C, L)
    y = jax.lax.conv_general_dilated(
        feat, weight.astype(jnp.float32), window_strides=(1,), padding=((1, 1),),
        dimension_numbers=("NCH", "OIH", "NCH"),
        feature_group_count=C,
    ) + bias.astype(jnp.float32).reshape(1, C, 1)
    y = y + feat                                   # stride == 1 residual
    y = jnp.transpose(y, (0, 2, 1)).astype(x.dtype)
    return jnp.concatenate([cls_token, y], axis=1)


if __name__ == "__main__":
    key = jax.random.PRNGKey(0)

    # Case 1: small f32, lane-dense (C = 128), B = 2 -> auto block picker splits the
    # batch axis so the parallel grid has 2 blocks.
    k1, k2, k3, key = jax.random.split(key, 4)
    B, C, size = 2, 128, 16
    N = size + 1
    x = jax.random.normal(k1, (B, N, C), dtype=jnp.float32)
    weight = jax.random.normal(k2, (C, 1, 3), dtype=jnp.float32) * 0.1
    bias = jax.random.normal(k3, (C,), dtype=jnp.float32) * 0.1

    out = jax.block_until_ready(pos_conv1d(x, weight, bias))
    ref = _reference(x, weight, bias)
    assert out.shape == (B, N, C)
    assert jnp.allclose(out, ref, atol=1e-5, rtol=1e-5), "case 1 mismatch vs reference"

    # Case 2: B == 1 single-batch inference -> auto picker splits channels into 2 tiles
    # so both v7x TensorCores get work.
    k1, k2, k3, key = jax.random.split(key, 4)
    B2, C2, size2 = 1, 256, 31
    N2 = size2 + 1
    x2 = jax.random.normal(k1, (B2, N2, C2), dtype=jnp.float32)
    weight2 = jax.random.normal(k2, (C2, 1, 3), dtype=jnp.float32) * 0.1
    bias2 = jax.random.normal(k3, (C2,), dtype=jnp.float32) * 0.1

    out2 = jax.block_until_ready(pos_conv1d(x2, weight2, bias2))
    ref2 = _reference(x2, weight2, bias2)
    assert out2.shape == (B2, N2, C2)
    assert jnp.allclose(out2, ref2, atol=1e-5, rtol=1e-5), "case 2 mismatch vs reference"

    # Case 3: bf16 storage (exercises the bf16-compute path on v6e/v7x, f32 on v5e/v4).
    k1, k2, k3, key = jax.random.split(key, 4)
    B3, C3, size3 = 2, 384, 49
    N3 = size3 + 1
    x3 = jax.random.normal(k1, (B3, N3, C3), dtype=jnp.float32).astype(jnp.bfloat16)
    weight3 = (jax.random.normal(k2, (C3, 1, 3), dtype=jnp.float32) * 0.1)
    bias3 = (jax.random.normal(k3, (C3,), dtype=jnp.float32) * 0.1)

    out3 = jax.block_until_ready(pos_conv1d(x3, weight3, bias3))
    ref3 = _reference(x3, weight3, bias3)
    assert out3.shape == (B3, N3, C3)
    assert jnp.allclose(out3.astype(jnp.float32), ref3.astype(jnp.float32),
                        atol=0.25, rtol=0.02), "case 3 mismatch vs reference"

    print("KERNEL_OK")
</pallas_src>

<mosaic_0001>
module attributes {stable_mosaic.version = 11 : i64} {
  func.func @_posconv_kernel(%arg0: i32, %arg1: i32, %arg2: memref<1x17x128xf32, #tpu.memory_space<vmem>>, %arg3: memref<4x128xf32, #tpu.memory_space<vmem>>, %arg4: memref<1x17x128xf32, #tpu.memory_space<vmem>>) attributes {dimension_semantics = [#tpu.dimension_semantics<parallel>, #tpu.dimension_semantics<parallel>], iteration_bounds = array<i64: 2, 1>, scalar_prefetch = 0 : i64, scratch_operands = 0 : i64, tpu.core_type = #tpu.core_type<tc>, window_params = [{transform_indices = @transform_0, window_bounds = array<i64: 1, 17, 128>}, {transform_indices = @transform_1, window_bounds = array<i64: 4, 128>}, {transform_indices = @transform_2, window_bounds = array<i64: 1, 17, 128>}]} {
    %c0 = arith.constant 0 : index
    %c0_0 = arith.constant 0 : index
    %c0_1 = arith.constant 0 : index
    %0 = vector.load %arg2[%c0, %c0_0, %c0_1] : memref<1x17x128xf32, #tpu.memory_space<vmem>>, vector<1x17x128xf32>
    %c0_2 = arith.constant 0 : index
    %c0_3 = arith.constant 0 : index
    %1 = vector.load %arg3[%c0_2, %c0_3] : memref<4x128xf32, #tpu.memory_space<vmem>>, vector<1x128xf32>
    %2 = vector.shape_cast %1 : vector<1x128xf32> to vector<1x1x128xf32>
    %c1 = arith.constant 1 : index
    %c0_4 = arith.constant 0 : index
    %3 = vector.load %arg3[%c1, %c0_4] : memref<4x128xf32, #tpu.memory_space<vmem>>, vector<1x128xf32>
    %4 = vector.shape_cast %3 : vector<1x128xf32> to vector<1x1x128xf32>
    %c2 = arith.constant 2 : index
    %c0_5 = arith.constant 0 : index
    %5 = vector.load %arg3[%c2, %c0_5] : memref<4x128xf32, #tpu.memory_space<vmem>>, vector<1x128xf32>
    %6 = vector.shape_cast %5 : vector<1x128xf32> to vector<1x1x128xf32>
    %c3 = arith.constant 3 : index
    %c0_6 = arith.constant 0 : index
    %7 = vector.load %arg3[%c3, %c0_6] : memref<4x128xf32, #tpu.memory_space<vmem>>, vector<1x128xf32>
    %8 = vector.shape_cast %7 : vector<1x128xf32> to vector<1x1x128xf32>
    %9 = vector.broadcast %4 : vector<1x1x128xf32> to vector<1x17x128xf32>
    %10 = arith.mulf %9, %0 : vector<1x17x128xf32>
    %11 = vector.broadcast %8 : vector<1x1x128xf32> to vector<1x17x128xf32>
    %12 = arith.addf %10, %11 : vector<1x17x128xf32>
    %cst = arith.constant 0.000000e+00 : f32
    %13 = vector.broadcast %cst : f32 to vector<1x2x128xf32>
    %14 = vector.extract_strided_slice %0 {offsets = [0, 1, 0], sizes = [1, 15, 128], strides = [1, 1, 1]} : vector<1x17x128xf32> to vector<1x15x128xf32>
    %15 = tpu.concatenate %13, %14 in 1 : vector<1x2x128xf32>, vector<1x15x128xf32> -> vector<1x17x128xf32>
    %16 = vector.broadcast %2 : vector<1x1x128xf32> to vector<1x17x128xf32>
    %17 = arith.mulf %16, %15 : vector<1x17x128xf32>
    %18 = arith.addf %12, %17 : vector<1x17x128xf32>
    %19 = vector.extract_strided_slice %0 {offsets = [0, 1, 0], sizes = [1, 16, 128], strides = [1, 1, 1]} : vector<1x17x128xf32> to vector<1x16x128xf32>
    %cst_7 = arith.constant 0.000000e+00 : f32
    %20 = vector.broadcast %cst_7 : f32 to vector<1x1x128xf32>
    %21 = tpu.concatenate %19, %20 in 1 : vector<1x16x128xf32>, vector<1x1x128xf32> -> vector<1x17x128xf32>
    %22 = vector.broadcast %6 : vector<1x1x128xf32> to vector<1x17x128xf32>
    %23 = arith.mulf %22, %21 : vector<1x17x128xf32>
    %24 = arith.addf %18, %23 : vector<1x17x128xf32>
    %c0_8 = arith.constant 0 : index
    %c0_9 = arith.constant 0 : index
    %c0_10 = arith.constant 0 : index
    %25 = vector.load %arg4[%c0_8, %c0_9, %c0_10] : memref<1x17x128xf32, #tpu.memory_space<vmem>>, vector<1x17x128xf32>
    tpu.vector_store %arg4[%c0_8, %c0_9, %c0_10], %24 {strides = array<i32>} : memref<1x17x128xf32, #tpu.memory_space<vmem>>, vector<1x17x128xf32>,
    %26 = vector.extract_strided_slice %0 {offsets = [0, 0, 0], sizes = [1, 1, 128], strides = [1, 1, 1]} : vector<1x17x128xf32> to vector<1x1x128xf32>
    %c0_11 = arith.constant 0 : index
    %c0_12 = arith.constant 0 : index
    %c0_13 = arith.constant 0 : index
    %27 = vector.load %arg4[%c0_11, %c0_12, %c0_13] : memref<1x17x128xf32, #tpu.memory_space<vmem>>, vector<1x1x128xf32>
    tpu.vector_store %arg4[%c0_11, %c0_12, %c0_13], %26 {strides = array<i32>} : memref<1x17x128xf32, #tpu.memory_space<vmem>>, vector<1x1x128xf32>,
    return
  }
  func.func @transform_0(%arg0: i32, %arg1: i32) -> (i32, i32, i32) {
    %c0_i32 = arith.constant 0 : i32
    %c0_i32_0 = arith.constant 0 : i32
    return %arg0, %c0_i32, %arg1 : i32, i32, i32
  }
  func.func @transform_1(%arg0: i32, %arg1: i32) -> (i32, i32) {
    %c0_i32 = arith.constant 0 : i32
    %c0_i32_0 = arith.constant 0 : i32
    return %c0_i32, %arg1 : i32, i32
  }
  func.func @transform_2(%arg0: i32, %arg1: i32) -> (i32, i32, i32) {
    %c0_i32 = arith.constant 0 : i32
    %c0_i32_0 = arith.constant 0 : i32
    return %arg0, %c0_i32, %arg1 : i32, i32, i32
  }
}

</mosaic_0001>

<bundles_post_ra>
// kernel: pos_conv1d.1
= control target key start
LH: loop header
LB: loop body
LE: loop exit
PB: predicated region body
PF: predicated region fallthrough
CT: control target
= control target key end

     0   :  { %s434_s9 = smov 0   ;;  %s436_s10 = smov 0   ;;  %s490_s0 = inlined_call_operand.vmem [shape: f32[2,17,128], index: 0, kind: input, shape index: {}]   ;;  %s491_s1 = inlined_call_operand.vmem [shape: f32[4,128], index: 1, kind: input, shape index: {}]   ;;  %s492_s2 = inlined_call_operand.vmem [shape: f32[2,17,128], index: 2, kind: output, shape index: {}]  }
   0x1   :  { %s438_s11 = smov 0  }
   0x2 LB: > { %s24_s12 = sadd.s32 1, %s413_s10  ;;  %p361_p0 = scmp.ge.s32.totalorder %s417_s11, 1  ;;  %s417_s11 = sphi %s438_s11, %s12_s11   ;;  %s413_s10 = sphi %s436_s10, %s494_s10   ;;  %s409_s9 = sphi %s434_s9, %s493_s9  }
   0x3   : > { %p26_p1 = scmp.ge.s32.totalorder %s24_s12, 2  ;;  %p140_p2 = scmp.lt.s32.totalorder %s417_s11, 3 }
   0x5   : > { %s496_s12 = smov (%p26_p1, %s24_s12), 0  ;;  %p141_p3 = pnand %p361_p0, %p140_p2 }
   0x6   : > { %p172_p4 = scmp.lt.s32.totalorder (!%p141_p3), %s409_s9, 1  ;;  %v364_v0 = vld [vmem:[%s491_s1 + $0x1] ss:$0 sm:$0xff] (!%p141_p3)  ;;  %v367_v1 = vld [vmem:[%s491_s1 + $0x2] ss:$0 sm:$0xff] (!%p141_p3)  ;;  %vm222_vm0 = vcmask (!%p141_p3), 1041408  }
   0x7   : > { %144 = sbr.rel (%p141_p3) target bundleno = 31 (0x1f), region = 28  ;;  %v365_v2 = vld [vmem:[%s491_s1 + $0x3] ss:$0 sm:$0xff] (!%p141_p3)  ;;  %vm235_vm1 = vcmask (!%p141_p3), 1046528   ;;  %vm215_vm2 = vcmask (!%p141_p3), 1040384   ;;  %v249_v18 = vmul.f32 (!%p141_p3), 0.0, %v367_v1 }
   0x8   : > { %v366_v6 = vld [vmem:[%s491_s1] ss:$0 sm:$0xff] (!%p141_p3) }
   0xe   : > { %s498_s9 = smov (!%p172_p4, %s409_s9), 1 }
   0xf   : > { %s370_s13 = smul.u32 24, %s498_s9 }
  0x11   : > { %s179_s18 = scalar_lea.vmem %s490_s0, %s370_s13  ;;  %s191_s27 = scalar_lea.vmem %s492_s2, %s370_s13 }
  0x12   : > { %v192_v3 = vld [vmem:[%s179_s18] sm:$0xff]  ;;  %v193_v4 = vld [vmem:[%s179_s18 + $0x8] sm:$0xff]  ;;  %v194_v5 = vld [vmem:[%s179_s18 + $0x10] sm:$0x1] }
  0x13   : > { %v203_v7 = vmul.f32 %v364_v0, %v192_v3  ;;  %v216_v8 = vrot.slane %v192_v3, 7  ;;  %v236_v9 = vrot.slane %v192_v3, 1  ;;  %v237_v10 = vrot.slane %v193_v4, 1 }
  0x14   : > { %v204_v11 = vmul.f32 %v364_v0, %v193_v4  ;;  %v217_v12 = vrot.slane %v193_v4, 7  ;;  %v239_v13 = vrot.slane %v194_v5, 1  ;;  %v205_v14 = vmul.f32 %v364_v0, %v194_v5 }
  0x15   : > { %v210_v15 = vadd.f32 %v365_v2, %v203_v7  ;;  %v223_v16 = vsel %vm222_vm0, 0.0, %v216_v8  ;;  %v238_v17 = vsel %vm235_vm1, %v236_v9, %v237_v10 }
  0x16   : > { %v228_v19 = vmul.f32 %v366_v6, %v223_v16  ;;  %v247_v20 = vmul.f32 %v367_v1, %v238_v17  ;;  %v211_v21 = vadd.f32 %v365_v2, %v204_v11  ;;  %v218_v22 = vsel %vm215_vm2, %v216_v8, %v217_v12 }
  0x17   : > { %v229_v23 = vmul.f32 %v366_v6, %v218_v22  ;;  %v240_v24 = vsel %vm235_vm1, %v237_v10, %v239_v13  ;;  %v212_v25 = vadd.f32 %v365_v2, %v205_v14  ;;  %v230_v26 = vmul.f32 %v366_v6, %v217_v12 }
  0x18   : > { %v231_v27 = vadd.f32 %v228_v19, %v210_v15  ;;  %v248_v28 = vmul.f32 %v367_v1, %v240_v24 }
  0x19   : > { %v232_v29 = vadd.f32 %v229_v23, %v211_v21  ;;  %v233_v30 = vadd.f32 %v230_v26, %v212_v25 }
  0x1a   : > { %v250_v31 = vadd.f32 %v247_v20, %v231_v27 }
  0x1b   : > { %v251_v32 = vadd.f32 %v248_v28, %v232_v29  ;;  %v252_v33 = vadd.f32 %v249_v18, %v233_v30 }
  0x1c   : > { %253 = vst [vmem:[%s191_s27] sm:$0xff] %v250_v31 }
  0x1d   : > { %256 = vst [vmem:[%s191_s27] sm:$0x1] %v192_v3  ;;  %254 = vst [vmem:[%s191_s27 + $0x8] sm:$0xff] %v251_v32 }
  0x1e   : > { %255 = vst [vmem:[%s191_s27 + $0x10] sm:$0x1] %v252_v33 }
  0x1f PF: > { %s12_s11 = sadd.s32 1, %s417_s11   ;;  %s493_s9 = smov %s413_s10 }
  0x20   : > { %p9_p5 = scmp.ge.s32.totalorder %s12_s11, 4   ;;  %s494_s10 = smov %s496_s12 }
  0x22   :  { %11 = sbr.rel (!%p9_p5) target bundleno = 2 (0x2), region = 61 }

</bundles_post_ra>
